<compile_context>
chip_gen: v7x
topology: tpu7x:2x2x1
jax: 0.10.0
libtpu: 0.0.40
codegen_flags: <defaults>
</compile_context>

<pallas_src>
import functools

import jax
import jax.numpy as jnp
from jax.experimental import pallas as pl
from jax.experimental.pallas import tpu as pltpu


def _round_up(a, b):
    return ((a + b - 1) // b) * b


def _am_linear_kernel(xn_ref, w_ref, lab_ref, adj_ref, cos_ref, wn_ref, *, m, s, tn):
    # xn_ref:  (tb, D)  f32   pre-normalized rows of x for this B-tile
    # w_ref:   (D, tn)  f32   raw weight columns for this N-tile (resident)
    # lab_ref: (tb, 1)  i32   label per row
    # adj_ref: (tb, tn) f32   s*cos - s*m*one_hot
    # cos_ref: (tb, tn) f32   clamped cosine similarity
    # wn_ref:  (D, tn)  f32   VMEM scratch holding the normalized weight tile
    j = pl.program_id(0)  # N-tile index (outer, parallel)
    i = pl.program_id(1)  # B-tile index (inner, arbitrary)

    # Column-wise L2 normalize the weight tile ONCE per N-tile; the scratch
    # persists across the inner B sweep.  Matches renorm(2,1,1e-5).mul(1e5)
    # (i.e. w / (||w_col|| + 1e-7)) for non-degenerate columns.
    @pl.when(i == 0)
    def _():
        w = w_ref[...]
        col_sumsq = jnp.sum(w * w, axis=0, keepdims=True)          # (1, tn)
        inv_norm = 1.0 / (jnp.sqrt(col_sumsq) + 1e-7)
        wn_ref[...] = w * inv_norm

    # MXU matmul, f32 accumulate.
    cos = jnp.dot(xn_ref[...], wn_ref[...], preferred_element_type=jnp.float32)
    cos = jnp.clip(cos, -1.0, 1.0)

    # One-hot(label) selection without scatter: tile-local lane iota compared
    # against the per-row label shifted into this tile's coordinate frame.
    rel = lab_ref[...] - j * tn                                      # (tb, 1)
    col = jax.lax.broadcasted_iota(jnp.int32, cos.shape, 1)          # (tb, tn)
    is_target = (col == rel).astype(cos.dtype)                       # (tb, tn)

    cos_ref[...] = cos.astype(cos_ref.dtype)
    adj_ref[...] = (s * cos - (s * m) * is_target).astype(adj_ref.dtype)


def am_linear(x, w, labels, *, m=0.35, s=30.0):
    """x: (B, D) f32, w: (D, N) f32, labels: (B,) int -> (adjust (B,N), cos (B,N))."""
    B, D = x.shape
    Dw, N = w.shape
    assert D == Dw, (D, Dw)

    # Row-wise L2 normalize x once in the wrapper (F.normalize(x, dim=1),
    # eps=1e-12).  O(B*D) — negligible vs. the O(B*D*N) matmul, and it removes
    # the per-grid-step renormalization from the kernel entirely.
    x_norm = jnp.sqrt(jnp.sum(x * x, axis=1, keepdims=True))
    xn = x / jnp.maximum(x_norm, 1e-12)

    # Tile sizes: sublane-aligned B tile, lane-aligned N tile.
    tb = min(256, _round_up(B, 8))
    tn = min(512, _round_up(N, 128))
    B_pad = _round_up(B, tb)
    N_pad = _round_up(N, tn)

    xn_p = xn if B_pad == B else jnp.pad(xn, ((0, B_pad - B), (0, 0)))
    w_p = w if N_pad == N else jnp.pad(w, ((0, 0), (0, N_pad - N)))
    lab_p = labels.astype(jnp.int32).reshape(B, 1)
    if B_pad != B:
        # Padded rows get label -1, which never matches a real column index.
        lab_p = jnp.pad(lab_p, ((0, B_pad - B), (0, 0)), constant_values=-1)

    nj = N_pad // tn
    nb = B_pad // tb
    grid = (nj, nb)  # N-tiles outer (parallel), B-tiles inner (arbitrary)
    kernel = functools.partial(_am_linear_kernel, m=float(m), s=float(s), tn=tn)

    # Cost estimate reflecting the actual streaming pattern: w read once,
    # x/labels re-streamed once per N-tile, two f32 output slabs written once.
    flops = 2 * B_pad * D * N_pad + 3 * D * N_pad + 4 * B_pad * N_pad
    transcendentals = N_pad  # one sqrt per weight column (hoisted, once each)
    bytes_accessed = 4 * (D * N_pad + nj * B_pad * D + 2 * B_pad * N_pad + nj * B_pad)

    adj, cos = pl.pallas_call(
        kernel,
        out_shape=(
            jax.ShapeDtypeStruct((B_pad, N_pad), x.dtype),
            jax.ShapeDtypeStruct((B_pad, N_pad), x.dtype),
        ),
        grid=grid,
        in_specs=[
            pl.BlockSpec((tb, D), lambda j, i: (i, 0)),   # x tile streams (inner)
            pl.BlockSpec((D, tn), lambda j, i: (0, j)),   # w tile resident over inner axis
            pl.BlockSpec((tb, 1), lambda j, i: (i, 0)),   # labels per B tile
        ],
        out_specs=(
            pl.BlockSpec((tb, tn), lambda j, i: (i, j)),
            pl.BlockSpec((tb, tn), lambda j, i: (i, j)),
        ),
        scratch_shapes=[pltpu.VMEM((D, tn), jnp.float32)],  # normalized w tile cache
        compiler_params=pltpu.CompilerParams(
            # Outer N axis shards across TensorCores; inner B axis must be
            # sequential because the wn scratch is reused across revisits.
            dimension_semantics=("parallel", "arbitrary"),
            vmem_limit_bytes=32 * 1024 * 1024,
        ),
        cost_estimate=pl.CostEstimate(
            flops=int(flops),
            transcendentals=int(transcendentals),
            bytes_accessed=int(bytes_accessed),
        ),
    )(xn_p, w_p, lab_p)

    if B_pad != B or N_pad != N:
        adj = adj[:B, :N]
        cos = cos[:B, :N]
    return adj, cos


def am_linear_ref(x, w, labels, *, m=0.35, s=30.0):
    # TODO(synk): renorm(2,1,1e-5) leaves columns with norm < 1e-5 un-normalized;
    # both kernel and reference force-normalize (only differs for degenerate columns).
    w_norm = jnp.sqrt(jnp.sum(w * w, axis=0, keepdims=True))
    ww = w / (w_norm + 1e-7)
    x_norm = jnp.sqrt(jnp.sum(x * x, axis=-1, keepdims=True))
    xn = x / jnp.maximum(x_norm, 1e-12)
    cos = jnp.clip(
        jnp.dot(xn, ww, precision=jax.lax.Precision.HIGHEST), -1.0, 1.0
    )
    one_hot = labels[:, None] == jnp.arange(w.shape[1], dtype=labels.dtype)[None, :]
    adj = s * jnp.where(one_hot, cos - m, cos)
    return adj, cos


if __name__ == "__main__":
    key = jax.random.PRNGKey(0)
    k1, k2, k3 = jax.random.split(key, 3)

    B, D, N = 4, 32, 10  # batch, in_features, n_classes
    x = jax.random.normal(k1, (B, D), dtype=jnp.float32)
    # Mimic AMLinear init (uniform(-1,1)); forward renormalizes columns anyway.
    w = jax.random.uniform(k2, (D, N), minval=-1.0, maxval=1.0, dtype=jnp.float32)
    labels = jax.random.randint(k3, (B,), 0, N, dtype=jnp.int32)

    adj, cos = am_linear(x, w, labels, m=0.35, s=30.0)
    jax.block_until_ready((adj, cos))

    adj_ref, cos_ref = am_linear_ref(x, w, labels, m=0.35, s=30.0)
    assert adj.shape == (B, N), adj.shape
    assert cos.shape == (B, N), cos.shape
    assert jnp.allclose(cos, cos_ref, atol=1e-4, rtol=1e-4), (cos, cos_ref)
    assert jnp.allclose(adj, adj_ref, atol=1e-3, rtol=1e-4), (adj, adj_ref)

    print("KERNEL_OK")
</pallas_src>

<mosaic_0001>
module attributes {stable_mosaic.version = 11 : i64} {
  func.func @_am_linear_kernel(%arg0: i32, %arg1: i32, %arg2: memref<8x32xf32, #tpu.memory_space<vmem>>, %arg3: memref<32x128xf32, #tpu.memory_space<vmem>>, %arg4: memref<8x1xi32, #tpu.memory_space<vmem>>, %arg5: memref<8x128xf32, #tpu.memory_space<vmem>>, %arg6: memref<8x128xf32, #tpu.memory_space<vmem>>, %arg7: memref<32x128xf32, #tpu.memory_space<vmem>>) attributes {dimension_semantics = [#tpu.dimension_semantics<parallel>, #tpu.dimension_semantics<arbitrary>], iteration_bounds = array<i64: 1, 1>, scalar_prefetch = 0 : i64, scratch_operands = 1 : i64, tpu.core_type = #tpu.core_type<tc>, window_params = [{transform_indices = @transform_0, window_bounds = array<i64: 8, 32>}, {transform_indices = @transform_1, window_bounds = array<i64: 32, 128>}, {transform_indices = @transform_2, window_bounds = array<i64: 8, 1>}, {transform_indices = @transform_3, window_bounds = array<i64: 8, 128>}, {transform_indices = @transform_4, window_bounds = array<i64: 8, 128>}]} {
    %c0_i32 = arith.constant 0 : i32
    %0 = arith.cmpi eq, %arg1, %c0_i32 : i32
    %1 = arith.extui %0 : i1 to i32
    %c0_i32_0 = arith.constant 0 : i32
    %2 = arith.cmpi ne, %1, %c0_i32_0 : i32
    scf.if %2 {
      %c0_14 = arith.constant 0 : index
      %c0_15 = arith.constant 0 : index
      %26 = vector.load %arg3[%c0_14, %c0_15] : memref<32x128xf32, #tpu.memory_space<vmem>>, vector<32x128xf32>
      %27 = arith.mulf %26, %26 : vector<32x128xf32>
      %cst_16 = arith.constant dense<0.000000e+00> : vector<128xf32>
      %28 = vector.multi_reduction <add>, %27, %cst_16 [0] : vector<32x128xf32> to vector<128xf32>
      %29 = vector.shape_cast %28 : vector<128xf32> to vector<1x128xf32>
      %30 = math.sqrt %29 : vector<1x128xf32>
      %cst_17 = arith.constant 1.000000e-07 : f32
      %31 = vector.broadcast %cst_17 : f32 to vector<1x128xf32>
      %32 = arith.addf %30, %31 : vector<1x128xf32>
      %cst_18 = arith.constant 1.000000e+00 : f32
      %33 = vector.broadcast %cst_18 : f32 to vector<1x128xf32>
      %34 = arith.divf %33, %32 : vector<1x128xf32>
      %35 = vector.broadcast %34 : vector<1x128xf32> to vector<32x128xf32>
      %36 = arith.mulf %26, %35 : vector<32x128xf32>
      %c0_19 = arith.constant 0 : index
      %c0_20 = arith.constant 0 : index
      %37 = vector.load %arg7[%c0_19, %c0_20] : memref<32x128xf32, #tpu.memory_space<vmem>>, vector<32x128xf32>
      tpu.vector_store %arg7[%c0_19, %c0_20], %36 {strides = array<i32>} : memref<32x128xf32, #tpu.memory_space<vmem>>, vector<32x128xf32>,
    } else {
    }
    %c0 = arith.constant 0 : index
    %c0_1 = arith.constant 0 : index
    %3 = vector.load %arg2[%c0, %c0_1] : memref<8x32xf32, #tpu.memory_space<vmem>>, vector<8x32xf32>
    %c0_2 = arith.constant 0 : index
    %c0_3 = arith.constant 0 : index
    %4 = vector.load %arg7[%c0_2, %c0_3] : memref<32x128xf32, #tpu.memory_space<vmem>>, vector<32x128xf32>
    %cst = arith.constant dense<0.000000e+00> : vector<8x128xf32>
    %5 = tpu.matmul %3, %4, %cst {dimension_numbers = #tpu.dot_dimension_numbers<[1], [0], [0], [1], [0, 0, 1, 1], [], []>} : vector<8x32xf32>, vector<32x128xf32>, vector<8x128xf32> -> vector<8x128xf32>
    %cst_4 = arith.constant -1.000000e+00 : f32
    %cst_5 = arith.constant 1.000000e+00 : f32
    %6 = vector.broadcast %cst_4 : f32 to vector<8x128xf32>
    %7 = arith.maximumf %6, %5 : vector<8x128xf32>
    %8 = vector.broadcast %cst_5 : f32 to vector<8x128xf32>
    %9 = arith.minimumf %8, %7 : vector<8x128xf32>
    %c0_6 = arith.constant 0 : index
    %c0_7 = arith.constant 0 : index
    %10 = vector.load %arg4[%c0_6, %c0_7] : memref<8x1xi32, #tpu.memory_space<vmem>>, vector<8x1xi32>
    %c128_i32 = arith.constant 128 : i32
    %11 = arith.muli %arg0, %c128_i32 : i32
    %12 = vector.broadcast %11 : i32 to vector<8x1xi32>
    %13 = arith.subi %10, %12 : vector<8x1xi32>
    %14 = tpu.iota {dimensions = array<i32: 1>} : vector<8x128xi32>
    %15 = vector.broadcast %13 : vector<8x1xi32> to vector<8x128xi32>
    %16 = arith.cmpi eq, %14, %15 : vector<8x128xi32>
    %17 = arith.extui %16 : vector<8x128xi1> to vector<8x128xi32>
    %18 = arith.sitofp %17 : vector<8x128xi32> to vector<8x128xf32>
    %c0_8 = arith.constant 0 : index
    %c0_9 = arith.constant 0 : index
    %19 = vector.load %arg6[%c0_8, %c0_9] : memref<8x128xf32, #tpu.memory_space<vmem>>, vector<8x128xf32>
    tpu.vector_store %arg6[%c0_8, %c0_9], %9 {strides = array<i32>} : memref<8x128xf32, #tpu.memory_space<vmem>>, vector<8x128xf32>,
    %cst_10 = arith.constant 3.000000e+01 : f32
    %20 = vector.broadcast %cst_10 : f32 to vector<8x128xf32>
    %21 = arith.mulf %20, %9 : vector<8x128xf32>
    %cst_11 = arith.constant 1.050000e+01 : f32
    %22 = vector.broadcast %cst_11 : f32 to vector<8x128xf32>
    %23 = arith.mulf %22, %18 : vector<8x128xf32>
    %24 = arith.subf %21, %23 : vector<8x128xf32>
    %c0_12 = arith.constant 0 : index
    %c0_13 = arith.constant 0 : index
    %25 = vector.load %arg5[%c0_12, %c0_13] : memref<8x128xf32, #tpu.memory_space<vmem>>, vector<8x128xf32>
    tpu.vector_store %arg5[%c0_12, %c0_13], %24 {strides = array<i32>} : memref<8x128xf32, #tpu.memory_space<vmem>>, vector<8x128xf32>,
    return
  }
  func.func @transform_0(%arg0: i32, %arg1: i32) -> (i32, i32) {
    %c0_i32 = arith.constant 0 : i32
    %c0_i32_0 = arith.constant 0 : i32
    return %arg1, %c0_i32 : i32, i32
  }
  func.func @transform_1(%arg0: i32, %arg1: i32) -> (i32, i32) {
    %c0_i32 = arith.constant 0 : i32
    %c0_i32_0 = arith.constant 0 : i32
    return %c0_i32, %arg0 : i32, i32
  }
  func.func @transform_2(%arg0: i32, %arg1: i32) -> (i32, i32) {
    %c0_i32 = arith.constant 0 : i32
    %c0_i32_0 = arith.constant 0 : i32
    return %arg1, %c0_i32 : i32, i32
  }
  func.func @transform_3(%arg0: i32, %arg1: i32) -> (i32, i32) {
    %c0_i32 = arith.constant 0 : i32
    return %arg1, %arg0 : i32, i32
  }
  func.func @transform_4(%arg0: i32, %arg1: i32) -> (i32, i32) {
    %c0_i32 = arith.constant 0 : i32
    return %arg1, %arg0 : i32, i32
  }
}

</mosaic_0001>

<bundles_post_ra>
// kernel: tpu_custom_call.1
= control target key start
LH: loop header
LB: loop body
LE: loop exit
PB: predicated region body
PF: predicated region fallthrough
CT: control target
= control target key end

     0   :  { %10 = vsyncpa [#allocation4], 0  ;;  %s385_s0 = inlined_call_operand.vmem [shape: f32[8,32], index: 0, kind: input, shape index: {}]   ;;  %s386_s1 = inlined_call_operand.hbm [shape: f32[32,128], index: 1, kind: input, shape index: {}]   ;;  %s387_s2 = inlined_call_operand.vmem [shape: s32[8,1], index: 2, kind: input, shape index: {}]   ;;  %s388_s3 = inlined_call_operand.hbm [shape: f32[8,128], index: 3, kind: output, shape index: {0}]   ;;  %s389_s4 = inlined_call_operand.hbm [shape: f32[8,128], index: 4, kind: output, shape index: {1}]  }
   0x1   :  { %11 = vsyncpa [#allocation5], 0 }
   0x2   :  { %12 = vsyncpa [#allocation8], 0  ;;  %s309_s15 = smov [#allocation3]   ;;  %s237_s19 = scalar_lea.hbm %s386_s1, 512 }
   0x3   :  { %s20_s16 = sshll.u32 %s309_s15, 4  ;;  %p238_p0 = scmp.ne.s32.totalorder %s386_s1, %s237_s19  ;;  %s21_s16 = int_to_ptr.vmem [resolvable:$true] %s20_s16 }
   0x4   :  { %p241_p1 = scmp.lt.u32.totalorder %s237_s19, %s386_s1 }
   0x6   :  { %p243_p2 = pnand %p241_p1, %p238_p0 }
   0x8   :  { %246 = shalt.err (!%p243_p2)
}
   0x9   :  { %s247_s24 = scalar_lea.vmem %s21_s16, 512  ;;  %p252_p4 = scmp.lt.s32.totalorder %s21_s16, %s21_s16 }
   0xa   :  { %p248_p3 = scmp.ne.s32.totalorder %s21_s16, %s247_s24  ;;  %p253_p5 = scmp.lt.s32.totalorder %s247_s24, %s247_s24 }
   0xc   :  { %p254_p6 = por %p253_p5, %p252_p4 }
   0xe   :  { %p255_p7 = pnand %p254_p6, %p248_p3 }
  0x10   :  { %258 = shalt.err (!%p255_p7)
}
  0x11   :  { %s310_s25 = smov 128   ;;  %s311_s26 = smov 8  }
  0x12   :  { %26 = dma.hbm_to_vmem [thread:$0]  %s386_s1, 512, %s21_s16, [#allocation4], %s310_s25, %s310_s25, %s311_s26  }
  0x13   :  { %303 = dma.done.wait [#allocation4], 512  }
  0x14   :  { %304 = vsyncadd [#allocation4], 4294966784  ;;  %v312_v0 = vmov 0.0|0.0   ;;  %vm313_vm0 = vmmov 0   ;;  %v314_v1 = vmov 0.0   ;;  %v315_v2 = vmov 0  }
  0x15   :  { %217 = vmatprep.subr.bf16.mxu0 %v312_v0  ;;  %214 = vmatprep.mubr.msk.f32.mxu0 %vm313_vm0, %v314_v1  ;;  %v36_v3 = vld [vmem:[#allocation3] sm:$0xff]  ;;  %v37_v4 = vld [vmem:[#allocation3 + $0x8] sm:$0xff]  ;;  %v38_v5 = vld [vmem:[#allocation3 + $0x10] sm:$0xff]  ;;  %vm76_vm3 = vcmask 261120   ;;  %v156_v35 = vlaneseq  ;;  %s316_s5 = smov [#allocation7]   ;;  %s317_s7 = smov [#allocation6]  }
  0x16   :  { %232 = vset.pattern.permute.xlu0 %v315_v2  ;;  %v39_v6 = vld [vmem:[#allocation3 + $0x18] sm:$0xff]  ;;  %v40_v7 = vmul.f32 %v36_v3, %v36_v3  ;;  %v41_v8 = vmul.f32 %v37_v4, %v37_v4  ;;  %v42_v9 = vmul.f32 %v38_v5, %v38_v5  ;;  %v152_v10 = vld [vmem:[%s387_s2] sm:$0xff]  ;;  %s185_s6 = sshll.u32 %s316_s5, 4  ;;  %s175_s8 = sshll.u32 %s317_s7, 4  ;;  %s186_s6 = int_to_ptr.vmem [resolvable:$true] %s185_s6  ;;  %s176_s8 = int_to_ptr.vmem [resolvable:$true] %s175_s8 }
  0x17   :  { %159 = vperm.xlu0 %232, %v152_v10   ;;  %v43_v11 = vmul.f32 %v39_v6, %v39_v6  ;;  %v71_v34 = vld [vmem:[%s385_s0] sm:$0xff]  ;;  %v157_v36 = vand.u32 127, %v156_v35  ;;  %s259_s9 = scalar_lea.vmem %s186_s6, 128  ;;  %p264_p9 = scmp.lt.s32.totalorder %s186_s6, %s186_s6 }
  0x18   :  { %v44_v12 = vadd.f32 %v41_v8, %v40_v7  ;;  %p260_p8 = scmp.ne.s32.totalorder %s186_s6, %s259_s9  ;;  %p265_p10 = scmp.lt.s32.totalorder %s259_s9, %s259_s9 }
  0x1a   :  { %v45_v13 = vadd.f32 %v44_v12, %v42_v9  ;;  %p266_p11 = por %p265_p10, %p264_p9 }
  0x1c   :  { %v46_v14 = vadd.f32 %v45_v13, %v43_v11  ;;  %p267_p12 = pnand %p266_p11, %p260_p8 }
  0x1e   :  { %v47_v15 = vrot.slane %v46_v14, 4 }
  0x20   :  { %v48_v16 = vadd.f32 %v47_v15, %v46_v14 }
  0x22   :  { %v49_v17 = vrot.slane %v48_v16, 2 }
  0x24   :  { %v50_v18 = vadd.f32 %v49_v17, %v48_v16 }
  0x26   :  { %v51_v19 = vrot.slane %v50_v18, 1 }
  0x28   :  { %v52_v20 = vadd.f32 %v51_v19, %v50_v18 }
  0x2a   :  { %233 = vrsqrt.f32 %v52_v20  ;;  %vm55_vm1 = vcmp.eq.f32.partialorder %v52_v20, inf  ;;  %v58_v22 = vand.u32 2147483648, %v52_v20  ;;  %vm57_vm2 = vcmp.eq.f32.partialorder %v52_v20, 0.0 }
  0x34   :  { %v234_v21 = vpop.eup %233 }
  0x35   :  { %v54_v23 = vmul.f32 %v234_v21, %v52_v20 }
  0x37   :  { %v56_v24 = vsel %vm55_vm1, %v52_v20, %v54_v23 }
  0x38   :  { %v59_v25 = vsel %vm57_vm2, %v58_v22, %v56_v24 }
  0x39   :  { %v60_v26 = vadd.f32 1e-07, %v59_v25 }
  0x3b   :  { %235 = vrcp.f32 %v60_v26 }
  0x45   :  { %v236_v27 = vpop.eup %235 }
  0x46   :  { %v63_v28 = vmul.f32 %v236_v27, %v36_v3  ;;  %v64_v29 = vmul.f32 %v236_v27, %v37_v4  ;;  %v65_v30 = vmul.f32 %v236_v27, %v38_v5  ;;  %v66_v31 = vmul.f32 %v236_v27, %v39_v6 }
  0x48   :  { %v218_v32 = vpack.c.bf16 %v64_v29, %v63_v28  ;;  %v221_v33 = vpack.c.bf16 %v66_v31, %v65_v30 }
  0x4a   :  { %219 = vmatpush3.bf16.msra.mxu0 %v218_v32 }
  0x4b   :  { %220 = vmatprep.subr.bf16.mxu0 %v312_v0 }
  0x4e   :  { %222 = vmatpush3.bf16.msra.mxu0 %v221_v33 }
  0x51   :  { %215 = vmatmul.mubr.msk.f32.vlgmr.msra.gmra.mrb[0].mxu0 %vm76_vm3, %v71_v34 }
  0x96   :  { %v160_v37 = vpop.permute.xlu0 %159 }
  0x97   :  { %vm161_vm4 = vcmp.eq.s32.totalorder %v157_v36, %v160_v37 }
  0x98   :  { %v200_v38 = vsel %vm161_vm4, 1.0, %v314_v1 }
  0x99   :  { %v166_v40 = vmul.f32 10.5, %v200_v38 }
 0x124   :  { %v146_v39 = vpop.f32.mrb[0].mxu0 }
 0x125   :  { %v199_v41 = vclamps-f32 %v146_v39, 1.0  ;;  %v216_v42 = vpop.f32.mrb[1].mxu0 }
 0x127   :  { %v165_v43 = vmul.f32 30.0, %v199_v41  ;;  %164 = vst [vmem:[#allocation7] sm:$0xff] %v199_v41 }
 0x128   :  { %270 = shalt.err (!%p267_p12)
}
 0x129   :  { %s271_s11 = scalar_lea.hbm %s389_s4, 128 }
 0x12a   :  { %p272_p13 = scmp.ne.s32.totalorder %s389_s4, %s271_s11  ;;  %p275_p0 = scmp.lt.u32.totalorder %s271_s11, %s389_s4 }
 0x12c   :  { %p277_p1 = pnand %p275_p0, %p272_p13 }
 0x12e   :  { %280 = shalt.err (!%p277_p1)
}
 0x12f   :  { %188 = dma.vmem_to_hbm [thread:$0]  %s186_s6, 128, %s389_s4, [#allocation8]   ;;  %v167_v44 = vsub.f32 %v165_v43, %v166_v40 }
 0x130   :  { %s281_s18 = scalar_lea.vmem %s176_s8, 128  ;;  %p286_p3 = scmp.lt.s32.totalorder %s176_s8, %s176_s8 }
 0x131   :  { %168 = vst [vmem:[#allocation6] sm:$0xff] %v167_v44  ;;  %p282_p2 = scmp.ne.s32.totalorder %s176_s8, %s281_s18  ;;  %p287_p4 = scmp.lt.s32.totalorder %s281_s18, %s281_s18 }
 0x133   :  { %p288_p5 = por %p287_p4, %p286_p3 }
 0x135   :  { %p289_p6 = pnand %p288_p5, %p282_p2 }
 0x137   :  { %292 = shalt.err (!%p289_p6)
}
 0x138   :  { %s293_s21 = scalar_lea.hbm %s388_s3, 128 }
 0x139   :  { %p294_p7 = scmp.ne.s32.totalorder %s388_s3, %s293_s21  ;;  %p297_p8 = scmp.lt.u32.totalorder %s293_s21, %s388_s3 }
 0x13b   :  { %p299_p9 = pnand %p297_p8, %p294_p7 }
 0x13d   :  { %302 = shalt.err (!%p299_p9)
}
 0x13e   :  { %178 = dma.vmem_to_hbm [thread:$0]  %s176_s8, 128, %s388_s3, [#allocation5]  }
 0x13f   :  { %305 = dma.done.wait [#allocation5], 128  }
 0x140   :  { %306 = vsyncadd [#allocation5], 4294967168 }
 0x141   :  { %307 = dma.done.wait [#allocation8], 128  }
 0x142   :  { %308 = vsyncadd [#allocation8], 4294967168 }
 0x143   :  { %195 = vsyncpa [#allocation4], 1 }
 0x144   :  { %196 = vsyncpa [#allocation5], 1 }
 0x145   :  { %197 = vsyncpa [#allocation8], 1 }

</bundles_post_ra>
